<compile_context>
chip_gen: v6e
topology: v6e:2x2x1
jax: 0.10.0
libtpu: 0.0.40
codegen_flags: <defaults>
</compile_context>

<pallas_src>
import functools

import jax
import jax.numpy as jnp
from jax.experimental import pallas as pl
from jax.experimental.pallas import tpu as pltpu

NUM_HEADS = 8
ATT_HIDDEN_SIZE = 64
RNN_SIZE = 64            # must equal ATT_HIDDEN_SIZE (gated residual mixes with h)
ATT_FEATS_DIM = 32
D_K = ATT_HIDDEN_SIZE // NUM_HEADS
SCALE = 1.0 / (D_K ** 0.5)
LN_EPS = 1e-5


def _attention_kernel(h_ref, f_ref, wq_ref, wkv_ref, wo_ref, wg_ref, bg_ref,
                      gamma_ref, beta_ref, kvmask_ref, segsum_ref, out_ref):
    # Blocks: h_ref (Bt, Lq, RNN), f_ref (Bt, Lk, FEATS), out_ref (Bt, Lq, H).
    bt, lq, _ = h_ref.shape
    _, lk, _ = f_ref.shape
    rows_q = bt * lq
    rows_k = bt * lk
    L = NUM_HEADS * lk                    # lane-dense score width (heads on lanes)

    h2 = h_ref[...].reshape(rows_q, RNN_SIZE)          # compute dtype (f32 or bf16)
    f2 = f_ref[...].reshape(rows_k, ATT_FEATS_DIM)
    cdt = h2.dtype
    h2_f32 = h2.astype(jnp.float32)

    # ---- Full-width projections: one Q matmul, one fused [K|V] matmul. ----
    q2 = jnp.dot(h2, wq_ref[...], preferred_element_type=jnp.float32)    # (rows_q, 64)
    kv2 = jnp.dot(f2, wkv_ref[...], preferred_element_type=jnp.float32)  # (rows_k, 128)

    # ---- Lane-dense multi-head attention core (block-diagonal expansion). ----
    # Expanded-row n = head*Lk + key; channel c = head*D_K + depth.
    # kvmask[n, c] = 1 iff n and c belong to the same head, so a single
    # full-width contraction over all 64 channels gives the per-head scores.
    q3 = q2.astype(cdt).reshape(bt, lq, ATT_HIDDEN_SIZE)
    kv3 = kv2.astype(cdt).reshape(bt, lk, 2 * ATT_HIDDEN_SIZE)
    kv_rep = jnp.concatenate([kv3] * NUM_HEADS, axis=1)                  # (bt, L, 128)
    kvmask = kvmask_ref[...]                                             # (L, 64)
    k_exp = kv_rep[:, :, :ATT_HIDDEN_SIZE] * kvmask                      # (bt, L, 64)
    v_exp = kv_rep[:, :, ATT_HIDDEN_SIZE:] * kvmask                      # (bt, L, 64)

    s = jnp.einsum('bqc,bnc->bqn', q3, k_exp,
                   preferred_element_type=jnp.float32) * SCALE           # (bt, lq, L)
    s2 = s.reshape(rows_q, L)
    # Row-global max is a valid stabilizer for every head segment (only breaks
    # if one head's scores trail the row max by >~80; unreachable here).
    s2 = s2 - jnp.max(s2, axis=-1, keepdims=True)
    p = jnp.exp(s2)                                                      # (rows_q, L)
    # Per-head denominators via one MXU matmul against the block-diagonal ones
    # matrix: every lane receives the sum of its own head's segment.
    denom = jnp.dot(p, segsum_ref[...], preferred_element_type=jnp.float32)
    p = p * pl.reciprocal(denom, approx=True)                            # EUP slot
    # TODO(synk): dropout on attention weights is a no-op (ATT_HIDDEN_DROP=0 / eval).

    ctx = jnp.einsum('bqn,bnc->bqc', p.astype(cdt).reshape(bt, lq, L), v_exp,
                     preferred_element_type=jnp.float32)                 # (bt, lq, 64)
    ctx2 = ctx.reshape(rows_q, ATT_HIDDEN_SIZE)

    # ---- Output projection + gate: single full-width matmuls. ----
    att = jnp.dot(ctx2.astype(cdt), wo_ref[...],
                  preferred_element_type=jnp.float32)                    # (rows_q, 64)
    g_in = jnp.concatenate([att.astype(cdt), h2], axis=-1)               # (rows_q, 128)
    gate = jax.nn.sigmoid(
        jnp.dot(g_in, wg_ref[...], preferred_element_type=jnp.float32)
        + bg_ref[...])                                                   # (rows_q, 64)
    mixed = gate * att + (1.0 - gate) * h2_f32

    # ---- LayerNorm over the hidden dim (population variance, eps=1e-5). ----
    mu = jnp.mean(mixed, axis=-1, keepdims=True)
    centered = mixed - mu
    var = jnp.mean(centered * centered, axis=-1, keepdims=True)
    out = centered * jax.lax.rsqrt(var + LN_EPS) * gamma_ref[...] + beta_ref[...]

    # TODO(synk): optionally flatten to a lane-dense (bt, Lq*H) output slab if the
    # profile shows the 64-wide masked store binding (needs an in-kernel relayout).
    out_ref[...] = out.reshape(bt, lq, ATT_HIDDEN_SIZE).astype(out_ref.dtype)


def _pick_block_batch(batch, lq, target_rows=1024):
    """Largest divisor of `batch` giving ~target_rows rows per grid step while
    keeping >=4 grid steps (>=2 for tiny batches) for DMA/compute overlap and
    v7x dual-TensorCore sharding of the 'parallel' axis."""
    if batch >= 4:
        min_grid = 4
    elif batch >= 2:
        min_grid = 2
    else:
        min_grid = 1
    bt = max(1, min(batch // min_grid, max(1, target_rows // max(lq, 1))))
    while batch % bt:
        bt -= 1
    return bt


@functools.partial(jax.jit, static_argnames=("compute_dtype", "block_batch"))
def attention_forward(h, att_feats, wq, wk, wv, wo, wg, bg, gamma, beta,
                      *, compute_dtype=jnp.float32, block_batch=None):
    B, Lq, _ = h.shape
    _, Lk, _ = att_feats.shape

    bt = _pick_block_batch(B, Lq) if block_batch is None else block_batch
    assert B % bt == 0, "block_batch must divide the batch size"

    cdt = compute_dtype
    # Fused [K|V] projection weight -> one (FEATS, 2H) matmul in-kernel.
    wkv = jnp.concatenate([wk, wv], axis=1)

    # All matmul operands in the compute dtype (bf16 hits the fast MXU path on
    # v5e / v6e / v7x; accumulation and post-matmul math stay f32 in-kernel).
    h_c = h.astype(cdt)
    f_c = att_feats.astype(cdt)
    wq_c = wq.astype(cdt)
    wkv_c = wkv.astype(cdt)
    wo_c = wo.astype(cdt)
    wg_c = wg.astype(cdt)

    # Head bookkeeping constants for the lane-dense attention core:
    #   kvmask[h*Lk+k, c] = 1 iff channel c belongs to head h   (block-diag K/V)
    #   segsum[n, n']     = 1 iff n, n' share a head segment    (per-head sums)
    L = NUM_HEADS * Lk
    n_head = jnp.arange(L, dtype=jnp.int32) // Lk
    c_head = jnp.arange(ATT_HIDDEN_SIZE, dtype=jnp.int32) // D_K
    kvmask = (n_head[:, None] == c_head[None, :]).astype(cdt)
    segsum = (n_head[:, None] == n_head[None, :]).astype(jnp.float32)

    # Small parameters live in VMEM once (not double-buffered per grid step).
    resident = pl.BlockSpec(memory_space=pltpu.MemorySpace.VMEM)

    return pl.pallas_call(
        _attention_kernel,
        out_shape=jax.ShapeDtypeStruct((B, Lq, ATT_HIDDEN_SIZE), jnp.float32),
        grid_spec=pltpu.PrefetchScalarGridSpec(
            num_scalar_prefetch=0,
            grid=(B // bt,),
            in_specs=[
                pl.BlockSpec((bt, Lq, RNN_SIZE), lambda b: (b, 0, 0)),
                pl.BlockSpec((bt, Lk, ATT_FEATS_DIM), lambda b: (b, 0, 0)),
                resident,  # wq
                resident,  # wkv
                resident,  # wo
                resident,  # wg
                resident,  # bg
                resident,  # gamma
                resident,  # beta
                resident,  # kvmask
                resident,  # segsum
            ],
            out_specs=pl.BlockSpec((bt, Lq, ATT_HIDDEN_SIZE), lambda b: (b, 0, 0)),
        ),
        compiler_params=pltpu.CompilerParams(
            dimension_semantics=("parallel",)),
    )(h_c, f_c, wq_c, wkv_c, wo_c, wg_c, bg, gamma, beta, kvmask, segsum)


def _reference_forward(h, att_feats, wq, wk, wv, wo, wg, bg, gamma, beta,
                       cast=None):
    """Pure-JAX reference mirroring the torch module.  `cast` (if given) is
    applied to every matmul operand to emulate the kernel's compute dtype."""
    c = (lambda x: x) if cast is None else cast
    B, Lq, _ = h.shape
    Lk = att_feats.shape[1]
    q = jnp.einsum('bqi,io->bqo', c(h), c(wq))
    k = jnp.einsum('bki,io->bko', c(att_feats), c(wk))
    v = jnp.einsum('bki,io->bko', c(att_feats), c(wv))
    qh = q.reshape(B, Lq, NUM_HEADS, D_K).transpose(0, 2, 1, 3)
    kh = k.reshape(B, Lk, NUM_HEADS, D_K).transpose(0, 2, 1, 3)
    vh = v.reshape(B, Lk, NUM_HEADS, D_K).transpose(0, 2, 1, 3)
    s = jnp.einsum('bhqd,bhkd->bhqk', c(qh), c(kh)) * SCALE
    p = jax.nn.softmax(s, axis=-1)
    att = jnp.einsum('bhqk,bhkd->bhqd', c(p), c(vh))
    att = att.transpose(0, 2, 1, 3).reshape(B, Lq, ATT_HIDDEN_SIZE)
    att = jnp.einsum('bqi,io->bqo', c(att), c(wo))
    g_in = jnp.concatenate([att, h], axis=-1)
    gate = jax.nn.sigmoid(jnp.einsum('bqi,io->bqo', c(g_in), c(wg)) + bg[0])
    mixed = gate * att + (1.0 - gate) * h
    mu = jnp.mean(mixed, axis=-1, keepdims=True)
    var = jnp.mean((mixed - mu) ** 2, axis=-1, keepdims=True)
    return (mixed - mu) * jax.lax.rsqrt(var + LN_EPS) * gamma[0] + beta[0]


def _uniform(key, shape, fan_in):
    bound = 1.0 / (fan_in ** 0.5)
    return jax.random.uniform(key, shape, jnp.float32, -bound, bound)


if __name__ == "__main__":
    B, Lq, Lk = 2, 8, 16

    key = jax.random.PRNGKey(0)
    keys = jax.random.split(key, 8)

    # Deterministic parameter init (torch nn.Linear-style uniform), stored as
    # (in_features, out_features).
    wq = _uniform(keys[0], (RNN_SIZE, ATT_HIDDEN_SIZE), RNN_SIZE)
    wk = _uniform(keys[1], (ATT_FEATS_DIM, ATT_HIDDEN_SIZE), ATT_FEATS_DIM)
    wv = _uniform(keys[2], (ATT_FEATS_DIM, ATT_HIDDEN_SIZE), ATT_FEATS_DIM)
    wo = _uniform(keys[3], (ATT_HIDDEN_SIZE, ATT_HIDDEN_SIZE), ATT_HIDDEN_SIZE)
    wg = _uniform(keys[4], (2 * ATT_HIDDEN_SIZE, ATT_HIDDEN_SIZE), 2 * ATT_HIDDEN_SIZE)
    bg = _uniform(keys[5], (1, ATT_HIDDEN_SIZE), 2 * ATT_HIDDEN_SIZE)
    gamma = jnp.ones((1, ATT_HIDDEN_SIZE), jnp.float32)   # LayerNorm weight
    beta = jnp.zeros((1, ATT_HIDDEN_SIZE), jnp.float32)   # LayerNorm bias

    h = jax.random.normal(keys[6], (B, Lq, RNN_SIZE), jnp.float32)
    att_feats = jax.random.normal(keys[7], (B, Lk, ATT_FEATS_DIM), jnp.float32)

    # --- f32 path (matches module semantics; approx-reciprocal softmax only) ---
    out = attention_forward(h, att_feats, wq, wk, wv, wo, wg, bg, gamma, beta)
    out = jax.block_until_ready(out)
    ref = _reference_forward(h, att_feats, wq, wk, wv, wo, wg, bg, gamma, beta)
    assert out.shape == (B, Lq, ATT_HIDDEN_SIZE)
    # Tolerance covers the EUP approximate reciprocal in the softmax (~1e-3 rel).
    assert jnp.allclose(out, ref, atol=1e-2, rtol=1e-2), "f32 mismatch vs reference"

    # --- bf16 matmul path (v5e / v6e / v7x fast-MXU optimization) ---
    out_bf16 = attention_forward(h, att_feats, wq, wk, wv, wo, wg, bg, gamma, beta,
                                 compute_dtype=jnp.bfloat16)
    out_bf16 = jax.block_until_ready(out_bf16)
    rd = lambda x: x.astype(jnp.bfloat16).astype(jnp.float32)
    ref_bf16 = _reference_forward(rd(h), rd(att_feats), wq, wk, wv, wo, wg, bg,
                                  gamma, beta, cast=rd)
    assert jnp.allclose(out_bf16, ref_bf16, atol=2e-2, rtol=2e-2), \
        "bf16 mismatch vs reference"

    print("KERNEL_OK")
</pallas_src>

<mosaic_0001>
module attributes {stable_mosaic.version = 11 : i64} {
  func.func @_attention_kernel(%arg0: i32, %arg1: memref<1x8x64xf32, #tpu.memory_space<vmem>>, %arg2: memref<1x16x32xf32, #tpu.memory_space<vmem>>, %arg3: memref<64x64xf32, #tpu.memory_space<vmem>>, %arg4: memref<32x128xf32, #tpu.memory_space<vmem>>, %arg5: memref<64x64xf32, #tpu.memory_space<vmem>>, %arg6: memref<128x64xf32, #tpu.memory_space<vmem>>, %arg7: memref<1x64xf32, #tpu.memory_space<vmem>>, %arg8: memref<1x64xf32, #tpu.memory_space<vmem>>, %arg9: memref<1x64xf32, #tpu.memory_space<vmem>>, %arg10: memref<128x64xf32, #tpu.memory_space<vmem>>, %arg11: memref<128x128xf32, #tpu.memory_space<vmem>>, %arg12: memref<1x8x64xf32, #tpu.memory_space<vmem>>) attributes {dimension_semantics = [#tpu.dimension_semantics<parallel>], iteration_bounds = array<i64: 2>, scalar_prefetch = 0 : i64, scratch_operands = 0 : i64, tpu.core_type = #tpu.core_type<tc>, window_params = [{transform_indices = @transform_0, window_bounds = array<i64: 1, 8, 64>}, {transform_indices = @transform_1, window_bounds = array<i64: 1, 16, 32>}, {pipeline_mode = #tpu.pipeline_mode<synchronous>, transform_indices = @transform_2, window_bounds = array<i64: 64, 64>}, {pipeline_mode = #tpu.pipeline_mode<synchronous>, transform_indices = @transform_3, window_bounds = array<i64: 32, 128>}, {pipeline_mode = #tpu.pipeline_mode<synchronous>, transform_indices = @transform_4, window_bounds = array<i64: 64, 64>}, {pipeline_mode = #tpu.pipeline_mode<synchronous>, transform_indices = @transform_5, window_bounds = array<i64: 128, 64>}, {pipeline_mode = #tpu.pipeline_mode<synchronous>, transform_indices = @transform_6, window_bounds = array<i64: 1, 64>}, {pipeline_mode = #tpu.pipeline_mode<synchronous>, transform_indices = @transform_7, window_bounds = array<i64: 1, 64>}, {pipeline_mode = #tpu.pipeline_mode<synchronous>, transform_indices = @transform_8, window_bounds = array<i64: 1, 64>}, {pipeline_mode = #tpu.pipeline_mode<synchronous>, transform_indices = @transform_9, window_bounds = array<i64: 128, 64>}, {pipeline_mode = #tpu.pipeline_mode<synchronous>, transform_indices = @transform_10, window_bounds = array<i64: 128, 128>}, {transform_indices = @transform_11, window_bounds = array<i64: 1, 8, 64>}]} {
    %c0 = arith.constant 0 : index
    %c0_0 = arith.constant 0 : index
    %c0_1 = arith.constant 0 : index
    %0 = vector.load %arg1[%c0, %c0_0, %c0_1] : memref<1x8x64xf32, #tpu.memory_space<vmem>>, vector<1x8x64xf32>
    %1 = vector.shape_cast %0 : vector<1x8x64xf32> to vector<8x64xf32>
    %c0_2 = arith.constant 0 : index
    %c0_3 = arith.constant 0 : index
    %c0_4 = arith.constant 0 : index
    %2 = vector.load %arg2[%c0_2, %c0_3, %c0_4] : memref<1x16x32xf32, #tpu.memory_space<vmem>>, vector<1x16x32xf32>
    %3 = vector.shape_cast %2 : vector<1x16x32xf32> to vector<16x32xf32>
    %c0_5 = arith.constant 0 : index
    %c0_6 = arith.constant 0 : index
    %4 = vector.load %arg3[%c0_5, %c0_6] : memref<64x64xf32, #tpu.memory_space<vmem>>, vector<64x64xf32>
    %cst = arith.constant dense<0.000000e+00> : vector<8x64xf32>
    %5 = tpu.matmul %1, %4, %cst {dimension_numbers = #tpu.dot_dimension_numbers<[1], [0], [0], [1], [0, 0, 1, 1], [], []>} : vector<8x64xf32>, vector<64x64xf32>, vector<8x64xf32> -> vector<8x64xf32>
    %c0_7 = arith.constant 0 : index
    %c0_8 = arith.constant 0 : index
    %6 = vector.load %arg4[%c0_7, %c0_8] : memref<32x128xf32, #tpu.memory_space<vmem>>, vector<32x128xf32>
    %cst_9 = arith.constant dense<0.000000e+00> : vector<16x128xf32>
    %7 = tpu.matmul %3, %6, %cst_9 {dimension_numbers = #tpu.dot_dimension_numbers<[1], [0], [0], [1], [0, 0, 1, 1], [], []>} : vector<16x32xf32>, vector<32x128xf32>, vector<16x128xf32> -> vector<16x128xf32>
    %8 = vector.shape_cast %5 : vector<8x64xf32> to vector<1x8x64xf32>
    %9 = vector.shape_cast %7 : vector<16x128xf32> to vector<1x16x128xf32>
    %10 = tpu.concatenate %9, %9, %9, %9, %9, %9, %9, %9 in 1 : vector<1x16x128xf32>, vector<1x16x128xf32>, vector<1x16x128xf32>, vector<1x16x128xf32>, vector<1x16x128xf32>, vector<1x16x128xf32>, vector<1x16x128xf32>, vector<1x16x128xf32> -> vector<1x128x128xf32>
    %c0_10 = arith.constant 0 : index
    %c0_11 = arith.constant 0 : index
    %11 = vector.load %arg10[%c0_10, %c0_11] : memref<128x64xf32, #tpu.memory_space<vmem>>, vector<128x64xf32>
    %12 = vector.extract_strided_slice %10 {offsets = [0, 0, 0], sizes = [1, 128, 64], strides = [1, 1, 1]} : vector<1x128x128xf32> to vector<1x128x64xf32>
    %13 = vector.shape_cast %11 : vector<128x64xf32> to vector<1x128x64xf32>
    %14 = arith.mulf %12, %13 : vector<1x128x64xf32>
    %15 = vector.extract_strided_slice %10 {offsets = [0, 0, 64], sizes = [1, 128, 64], strides = [1, 1, 1]} : vector<1x128x128xf32> to vector<1x128x64xf32>
    %16 = vector.shape_cast %11 : vector<128x64xf32> to vector<1x128x64xf32>
    %17 = arith.mulf %15, %16 : vector<1x128x64xf32>
    "tpu.trace_start"() <{level = 10 : i32, message = "bqc,bnc->bqn"}> : () -> ()
    %cst_12 = arith.constant dense<0.000000e+00> : vector<1x8x128xf32>
    %18 = tpu.matmul %8, %14, %cst_12 {dimension_numbers = #tpu.dot_dimension_numbers<[2], [2], [1], [1], [0, 0, 0, 1, 1, 1], [0], [0]>} : vector<1x8x64xf32>, vector<1x128x64xf32>, vector<1x8x128xf32> -> vector<1x8x128xf32>
    "tpu.trace_stop"() : () -> ()
    %cst_13 = arith.constant 0.353553385 : f32
    %19 = vector.broadcast %cst_13 : f32 to vector<1x8x128xf32>
    %20 = arith.mulf %18, %19 : vector<1x8x128xf32>
    %21 = vector.shape_cast %20 : vector<1x8x128xf32> to vector<8x128xf32>
    %cst_14 = arith.constant dense<0xFF800000> : vector<8xf32>
    %22 = vector.multi_reduction <maximumf>, %21, %cst_14 [1] : vector<8x128xf32> to vector<8xf32>
    %23 = vector.shape_cast %22 : vector<8xf32> to vector<8x1xf32>
    %24 = vector.broadcast %23 : vector<8x1xf32> to vector<8x128xf32>
    %25 = arith.subf %21, %24 : vector<8x128xf32>
    %26 = math.exp %25 : vector<8x128xf32>
    %c0_15 = arith.constant 0 : index
    %c0_16 = arith.constant 0 : index
    %27 = vector.load %arg11[%c0_15, %c0_16] : memref<128x128xf32, #tpu.memory_space<vmem>>, vector<128x128xf32>
    %cst_17 = arith.constant dense<0.000000e+00> : vector<8x128xf32>
    %28 = tpu.matmul %26, %27, %cst_17 {dimension_numbers = #tpu.dot_dimension_numbers<[1], [0], [0], [1], [0, 0, 1, 1], [], []>} : vector<8x128xf32>, vector<128x128xf32>, vector<8x128xf32> -> vector<8x128xf32>
    %29 = tpu.reciprocal %28 {approx = true} : vector<8x128xf32> -> vector<8x128xf32>
    %30 = arith.mulf %26, %29 : vector<8x128xf32>
    %31 = vector.shape_cast %30 : vector<8x128xf32> to vector<1x8x128xf32>
    "tpu.trace_start"() <{level = 10 : i32, message = "bqn,bnc->bqc"}> : () -> ()
    %cst_18 = arith.constant dense<0.000000e+00> : vector<1x8x64xf32>
    %32 = tpu.matmul %31, %17, %cst_18 {dimension_numbers = #tpu.dot_dimension_numbers<[2], [1], [1], [2], [0, 0, 0, 1, 1, 2], [0], [0]>} : vector<1x8x128xf32>, vector<1x128x64xf32>, vector<1x8x64xf32> -> vector<1x8x64xf32>
    "tpu.trace_stop"() : () -> ()
    %33 = vector.shape_cast %32 : vector<1x8x64xf32> to vector<8x64xf32>
    %c0_19 = arith.constant 0 : index
    %c0_20 = arith.constant 0 : index
    %34 = vector.load %arg5[%c0_19, %c0_20] : memref<64x64xf32, #tpu.memory_space<vmem>>, vector<64x64xf32>
    %cst_21 = arith.constant dense<0.000000e+00> : vector<8x64xf32>
    %35 = tpu.matmul %33, %34, %cst_21 {dimension_numbers = #tpu.dot_dimension_numbers<[1], [0], [0], [1], [0, 0, 1, 1], [], []>} : vector<8x64xf32>, vector<64x64xf32>, vector<8x64xf32> -> vector<8x64xf32>
    %36 = tpu.concatenate %35, %1 in 1 : vector<8x64xf32>, vector<8x64xf32> -> vector<8x128xf32>
    %c0_22 = arith.constant 0 : index
    %c0_23 = arith.constant 0 : index
    %37 = vector.load %arg6[%c0_22, %c0_23] : memref<128x64xf32, #tpu.memory_space<vmem>>, vector<128x64xf32>
    %cst_24 = arith.constant dense<0.000000e+00> : vector<8x64xf32>
    %38 = tpu.matmul %36, %37, %cst_24 {dimension_numbers = #tpu.dot_dimension_numbers<[1], [0], [0], [1], [0, 0, 1, 1], [], []>} : vector<8x128xf32>, vector<128x64xf32>, vector<8x64xf32> -> vector<8x64xf32>
    %c0_25 = arith.constant 0 : index
    %c0_26 = arith.constant 0 : index
    %39 = vector.load %arg7[%c0_25, %c0_26] : memref<1x64xf32, #tpu.memory_space<vmem>>, vector<1x64xf32>
    %40 = vector.broadcast %39 : vector<1x64xf32> to vector<8x64xf32>
    %41 = arith.addf %38, %40 : vector<8x64xf32>
    %42 = arith.negf %41 : vector<8x64xf32>
    %43 = math.exp %42 : vector<8x64xf32>
    %cst_27 = arith.constant 1.000000e+00 : f32
    %44 = vector.broadcast %cst_27 : f32 to vector<8x64xf32>
    %45 = arith.addf %44, %43 : vector<8x64xf32>
    %46 = arith.divf %44, %45 : vector<8x64xf32>
    %47 = arith.mulf %46, %35 : vector<8x64xf32>
    %cst_28 = arith.constant 1.000000e+00 : f32
    %48 = vector.broadcast %cst_28 : f32 to vector<8x64xf32>
    %49 = arith.subf %48, %46 : vector<8x64xf32>
    %50 = arith.mulf %49, %1 : vector<8x64xf32>
    %51 = arith.addf %47, %50 : vector<8x64xf32>
    %cst_29 = arith.constant dense<0.000000e+00> : vector<8xf32>
    %52 = vector.multi_reduction <add>, %51, %cst_29 [1] : vector<8x64xf32> to vector<8xf32>
    %53 = vector.shape_cast %52 : vector<8xf32> to vector<8x1xf32>
    %cst_30 = arith.constant 6.400000e+01 : f32
    %54 = vector.broadcast %cst_30 : f32 to vector<8x1xf32>
    %55 = arith.divf %53, %54 : vector<8x1xf32>
    %56 = vector.broadcast %55 : vector<8x1xf32> to vector<8x64xf32>
    %57 = arith.subf %51, %56 : vector<8x64xf32>
    %58 = arith.mulf %57, %57 : vector<8x64xf32>
    %cst_31 = arith.constant dense<0.000000e+00> : vector<8xf32>
    %59 = vector.multi_reduction <add>, %58, %cst_31 [1] : vector<8x64xf32> to vector<8xf32>
    %60 = vector.shape_cast %59 : vector<8xf32> to vector<8x1xf32>
    %cst_32 = arith.constant 6.400000e+01 : f32
    %61 = vector.broadcast %cst_32 : f32 to vector<8x1xf32>
    %62 = arith.divf %60, %61 : vector<8x1xf32>
    %cst_33 = arith.constant 9.99999974E-6 : f32
    %63 = vector.broadcast %cst_33 : f32 to vector<8x1xf32>
    %64 = arith.addf %62, %63 : vector<8x1xf32>
    %65 = math.rsqrt %64 : vector<8x1xf32>
    %66 = vector.broadcast %65 : vector<8x1xf32> to vector<8x64xf32>
    %67 = arith.mulf %57, %66 : vector<8x64xf32>
    %c0_34 = arith.constant 0 : index
    %c0_35 = arith.constant 0 : index
    %68 = vector.load %arg8[%c0_34, %c0_35] : memref<1x64xf32, #tpu.memory_space<vmem>>, vector<1x64xf32>
    %69 = vector.broadcast %68 : vector<1x64xf32> to vector<8x64xf32>
    %70 = arith.mulf %67, %69 : vector<8x64xf32>
    %c0_36 = arith.constant 0 : index
    %c0_37 = arith.constant 0 : index
    %71 = vector.load %arg9[%c0_36, %c0_37] : memref<1x64xf32, #tpu.memory_space<vmem>>, vector<1x64xf32>
    %72 = vector.broadcast %71 : vector<1x64xf32> to vector<8x64xf32>
    %73 = arith.addf %70, %72 : vector<8x64xf32>
    %74 = vector.shape_cast %73 : vector<8x64xf32> to vector<1x8x64xf32>
    %c0_38 = arith.constant 0 : index
    %c0_39 = arith.constant 0 : index
    %c0_40 = arith.constant 0 : index
    %75 = vector.load %arg12[%c0_38, %c0_39, %c0_40] : memref<1x8x64xf32, #tpu.memory_space<vmem>>, vector<1x8x64xf32>
    tpu.vector_store %arg12[%c0_38, %c0_39, %c0_40], %74 {strides = array<i32>} : memref<1x8x64xf32, #tpu.memory_space<vmem>>, vector<1x8x64xf32>,
    return
  }
  func.func @transform_0(%arg0: i32) -> (i32, i32, i32) {
    %c0_i32 = arith.constant 0 : i32
    %c0_i32_0 = arith.constant 0 : i32
    %c0_i32_1 = arith.constant 0 : i32
    return %arg0, %c0_i32, %c0_i32_0 : i32, i32, i32
  }
  func.func @transform_1(%arg0: i32) -> (i32, i32, i32) {
    %c0_i32 = arith.constant 0 : i32
    %c0_i32_0 = arith.constant 0 : i32
    %c0_i32_1 = arith.constant 0 : i32
    return %arg0, %c0_i32, %c0_i32_0 : i32, i32, i32
  }
  func.func @transform_2(%arg0: i32) -> (i32, i32) {
    %c0_i32 = arith.constant 0 : i32
    %c0_i32_0 = arith.constant 0 : i32
    %c0_i32_1 = arith.constant 0 : i32
    return %c0_i32, %c0_i32_0 : i32, i32
  }
  func.func @transform_3(%arg0: i32) -> (i32, i32) {
    %c0_i32 = arith.constant 0 : i32
    %c0_i32_0 = arith.constant 0 : i32
    %c0_i32_1 = arith.constant 0 : i32
    return %c0_i32, %c0_i32_0 : i32, i32
  }
  func.func @transform_4(%arg0: i32) -> (i32, i32) {
    %c0_i32 = arith.constant 0 : i32
    %c0_i32_0 = arith.constant 0 : i32
    %c0_i32_1 = arith.constant 0 : i32
    return %c0_i32, %c0_i32_0 : i32, i32
  }
  func.func @transform_5(%arg0: i32) -> (i32, i32) {
    %c0_i32 = arith.constant 0 : i32
    %c0_i32_0 = arith.constant 0 : i32
    %c0_i32_1 = arith.constant 0 : i32
    return %c0_i32, %c0_i32_0 : i32, i32
  }
  func.func @transform_6(%arg0: i32) -> (i32, i32) {
    %c0_i32 = arith.constant 0 : i32
    %c0_i32_0 = arith.constant 0 : i32
    %c0_i32_1 = arith.constant 0 : i32
    return %c0_i32, %c0_i32_0 : i32, i32
  }
  func.func @transform_7(%arg0: i32) -> (i32, i32) {
    %c0_i32 = arith.constant 0 : i32
    %c0_i32_0 = arith.constant 0 : i32
    %c0_i32_1 = arith.constant 0 : i32
    return %c0_i32, %c0_i32_0 : i32, i32
  }
  func.func @transform_8(%arg0: i32) -> (i32, i32) {
    %c0_i32 = arith.constant 0 : i32
    %c0_i32_0 = arith.constant 0 : i32
    %c0_i32_1 = arith.constant 0 : i32
    return %c0_i32, %c0_i32_0 : i32, i32
  }
  func.func @transform_9(%arg0: i32) -> (i32, i32) {
    %c0_i32 = arith.constant 0 : i32
    %c0_i32_0 = arith.constant 0 : i32
    %c0_i32_1 = arith.constant 0 : i32
    return %c0_i32, %c0_i32_0 : i32, i32
  }
  func.func @transform_10(%arg0: i32) -> (i32, i32) {
    %c0_i32 = arith.constant 0 : i32
    %c0_i32_0 = arith.constant 0 : i32
    %c0_i32_1 = arith.constant 0 : i32
    return %c0_i32, %c0_i32_0 : i32, i32
  }
  func.func @transform_11(%arg0: i32) -> (i32, i32, i32) {
    %c0_i32 = arith.constant 0 : i32
    %c0_i32_0 = arith.constant 0 : i32
    %c0_i32_1 = arith.constant 0 : i32
    return %arg0, %c0_i32, %c0_i32_0 : i32, i32, i32
  }
}

</mosaic_0001>

<bundles_post_ra>
// kernel: attention_forward.1
= control target key start
LH: loop header
LB: loop body
LE: loop exit
PB: predicated region body
PF: predicated region fallthrough
CT: control target
= control target key end

     0   :  { %16 = vsyncpa [#allocation3], 0  ;;  %s2397_s0 = inlined_call_operand.vmem [shape: f32[2,8,64], index: 0, kind: input, shape index: {}]   ;;  %s2398_s1 = inlined_call_operand.vmem [shape: f32[2,16,32], index: 1, kind: input, shape index: {}]   ;;  %s2399_s2 = inlined_call_operand.vmem [shape: f32[64,64], index: 2, kind: input, shape index: {}]   ;;  %s2400_s3 = inlined_call_operand.vmem [shape: f32[32,128], index: 3, kind: input, shape index: {}]   ;;  %s2401_s4 = inlined_call_operand.vmem [shape: f32[64,64], index: 4, kind: input, shape index: {}]   ;;  %s2402_s5 = inlined_call_operand.vmem [shape: f32[128,64], index: 5, kind: input, shape index: {}]   ;;  %s2403_s6 = inlined_call_operand.vmem [shape: f32[1,64], index: 6, kind: input, shape index: {}]   ;;  %s2404_s7 = inlined_call_operand.vmem [shape: f32[1,64], index: 7, kind: input, shape index: {}]   ;;  %s2405_s8 = inlined_call_operand.vmem [shape: f32[1,64], index: 8, kind: input, shape index: {}]   ;;  %s2406_s9 = inlined_call_operand.vmem [shape: f32[128,64], index: 9, kind: input, shape index: {}]   ;;  %s2407_s10 = inlined_call_operand.vmem [shape: f32[128,128], index: 10, kind: input, shape index: {}]   ;;  %s2408_s11 = inlined_call_operand.hbm [shape: f32[2,8,64], index: 11, kind: output, shape index: {}]  }
   0x1   :  { %18 = vsyncpa [#allocation3 + $0x1], 0  ;;  %s1835_s17 = smov 0   ;;  %s1837_s18 = smov 0  }
   0x2   :  { %s1839_s19 = smov 0   ;;  %s1841_s20 = smov 0  }
   0x3 LB: > { %2414 = sst [smem:[#allocation5_spill]] %s1765_s19  ;;  %s1856_s21 = sadd.s32 4294967295, %s1769_s20   ;;  %s1769_s20 = sphi %s1841_s20, %s2420_s20   ;;  %s1765_s19 = sphi %s1839_s19, %s2422_s19   ;;  %s1761_s18 = sphi %s1837_s18, %s2424_s18   ;;  %s1757_s17 = sphi %s1835_s17, %s2423_s17  }
   0x4   : > { %s1338_s22 = sadd.s32 4294967294, %s1769_s20   ;;  %s1860_s23 = sadd.s32 1, %s1769_s20  }
   0x5   : > { %2415 = sst [smem:[#allocation6_spill]] %s1860_s23  ;;  %s272_s24 = sadd.s32 1, %s1765_s19 }
   0x6   : > { %s269_s25 = ssub.s32 %s1769_s20, %s1860_s23  ;;  %p282_p0 = scmp.ne.s32.totalorder %s1765_s19, %s1761_s18 }
   0x7   : > { %p270_p1 = scmp.eq.s32.totalorder %s269_s25, 0  ;;  %p283_p2 = scmp.eq.s32.totalorder %s1856_s21, 1 }
   0x8   : > { %p288_p3 = scmp.ne.s32.totalorder %s1761_s18, %s1757_s17  ;;  %p289_p4 = scmp.eq.s32.totalorder %s1338_s22, 1 }
   0x9   : > { %s1871_s26 = scalar_select %p270_p1, %s1765_s19, %s272_s24  }
   0xa   : > { %p1873_p5 = por %p283_p2, %p282_p0  ;;  %p1877_p6 = por %p289_p4, %p288_p3 }
   0xb   : > { %2416 = sst [smem:[#allocation7_spill]] %s1871_s26  ;;  %p1341_p7 = scmp.ge.s32.totalorder %s1769_s20, 1 }
   0xc   : > { %p349_p8 = scmp.lt.s32.totalorder %s1769_s20, 3 }
   0xe   : > { %p350_p9 = pnand %p1341_p7, %p349_p8 }
   0xf   : > { %p393_p10 = scmp.lt.s32.totalorder (!%p350_p9), %s1856_s21, 1  ;;  %s2410_s30 = smov (!%p350_p9), 64  }
  0x10   : > { %353 = sbr.rel (%p350_p9) target bundleno = 1805 (0x70d), region = 64  ;;  %s2419_s23 = smov (!%p350_p9), 64  }
  0x11   : > { %s1372_s13 = sshll.u32 (!%p350_p9), %s1856_s21, 7 }
  0x15   : > { %v412_v0 = vld [vmem:[%s2399_s2 + $0x38] sm:$0xff]  ;;  %v1771_v1 = vmov 0.0   ;;  %v411_v2 = vld [vmem:[%s2399_s2 + $0x30] sm:$0xff]  ;;  %vm1772_vm0 = vmmov 0   ;;  %v410_v3 = vld [vmem:[%s2399_s2 + $0x28] sm:$0xff]  ;;  %s394_s16 = scalar_select %p393_p10, %s1856_s21, 1 }
  0x16   : > { %1468 = vmatprep.subr.mxu1 %v1771_v1  ;;  %1484 = vmatprep.mubr.msk.f32.mxu1 %vm1772_vm0, %v1771_v1  ;;  %v1904_v4 = vld [vmem:[%s2406_s9 + $0x70] sm:$0xff]  ;;  %v409_v5 = vld [vmem:[%s2399_s2 + $0x20] sm:$0xff]  ;;  %v1915_v6 = vld [vmem:[%s2406_s9 + $0x68] sm:$0xff]  ;;  %vm413_vm1 = vcmask 523264   ;;  %vm491_vm2 = vcmask 261120  }
  0x17   : > { %1469 = vmatpush3.msra.mxu1 %v412_v0  ;;  %1533 = vmatprep.subr.mxu0 %v1771_v1  ;;  %v408_v7 = vld [vmem:[%s2399_s2 + $0x18] sm:$0xff]  ;;  %s1343_s22 = sshll.u32 %s394_s16, 3  ;;  %v407_v8 = vld [vmem:[%s2399_s2 + $0x10] sm:$0xff]  ;;  %s1375_s29 = sshll.u32 %s394_s16, 4  ;;  %v1930_v9 = vld [vmem:[%s2406_s9 + $0x60] sm:$0xff] }
  0x18   : > { %1470 = vmatprep.subr.mxu1 %v1771_v1  ;;  %1565 = vmatprep.mubr.msk.f32.mxu0 %vm1772_vm0, %v1771_v1  ;;  %v406_v10 = vld [vmem:[%s2399_s2 + $0x8] sm:$0xff]  ;;  %s396_s24 = scalar_lea.vmem %s2397_s0, %s1343_s22  ;;  %v405_v11 = vld [vmem:[%s2399_s2] sm:$0xff]  ;;  %v490_v13 = vld [vmem:[%s2400_s3 + $0x18] sm:$0xff]  ;;  %s1774_s16 = smov [#allocation2]  }
  0x19   : > { %1471 = vmatpush3.msra.mxu1 %v411_v2  ;;  %649 = vrot.lane.b32.xlu1 %v1904_v4, %s2410_s30  ;;  %v1948_v12 = vld [vmem:[%s396_s24] sm:$0xff]  ;;  %v489_v15 = vld [vmem:[%s2400_s3 + $0x10] sm:$0xff]  ;;  %v1960_v16 = vld [vmem:[%s2406_s9 + $0x58] sm:$0xff]  ;;  %s1713_s25 = sshll.u32 %s1774_s16, 4  ;;  %s1714_s25 = int_to_ptr.vmem [resolvable:$false] %s1713_s25 }
  0x1a   : > { %1472 = vmatprep.subr.mxu1 %v1771_v1  ;;  %v488_v17 = vld [vmem:[%s2400_s3 + $0x8] sm:$0xff]  ;;  %v487_v18 = vld [vmem:[%s2400_s3] sm:$0xff]  ;;  %v583_v19 = vld [vmem:[%s2406_s9 + $0x50] sm:$0xff]  ;;  %s1715_s21 = scalar_lea.vmem %s1714_s25, 256 }
  0x1b   : > { %1473 = vmatpush3.msra.mxu1 %v410_v3  ;;  %v582_v21 = vld [vmem:[%s2406_s9 + $0x48] sm:$0xff]  ;;  %v581_v22 = vld [vmem:[%s2406_s9 + $0x40] sm:$0xff]  ;;  %v1992_v23 = vld [vmem:[%s2406_s9 + $0x30] sm:$0xff] }
  0x1c   : > { %1474 = vmatprep.subr.mxu1 %v1771_v1  ;;  %v1999_v24 = vld [vmem:[%s2406_s9 + $0x20] sm:$0xff]  ;;  %v2006_v25 = vld [vmem:[%s2406_s9 + $0x10] sm:$0xff]  ;;  %v2028_v35 = vld [vmem:[%s2406_s9 + $0x78] sm:$0xff] }
  0x1d   : > { %1475 = vmatpush3.msra.mxu1 %v409_v5  ;;  %647 = vrot.lane.b32.xlu1 %v1915_v6, %s2410_s30  ;;  %s401_s30 = scalar_lea.vmem %s2398_s1, %s1375_s29  ;;  %v2013_v26 = vld [vmem:[%s2406_s9] sm:$0xff]  ;;  %v2078_v58 = vld [vmem:[%s2406_s9 + $0x38] sm:$0xff]  ;;  %v2093_v62 = vld [vmem:[%s2406_s9 + $0x28] sm:$0xff]  ;;  %s1265_s29 = scalar_lea.hbm %s2408_s11, %s1372_s13 }
  0x1e   : > { %1476 = vmatprep.subr.mxu1 %v1771_v1  ;;  %v403_v14 = vld [vmem:[%s401_s30] sm:$0xff]  ;;  %v404_v20 = vld [vmem:[%s401_s30 + $0x8] sm:$0xff]  ;;  %v2106_v2 = vld [vmem:[%s2406_s9 + $0x18] sm:$0xff]  ;;  %s390_s30 = sand.u32 1, %s1761_s18  }
  0x1f   : > { %1477 = vmatpush3.msra.mxu1 %v408_v7  ;;  %v2119_v5 = vld [vmem:[%s2406_s9 + $0x8] sm:$0xff]  ;;  %s1342_s15 = sshll.u32 %s390_s30, 3  ;;  %s1254_s14 = scalar_lea.sflag [#allocation3], %s390_s30 }
  0x20   : > { %1478 = vmatprep.subr.mxu1 %v1771_v1  ;;  %s392_s19 = scalar_lea.vmem [#allocation2], %s1342_s15 }
  0x21   : > { %1479 = vmatpush3.msra.mxu1 %v407_v8  ;;  %645 = vrot.lane.b32.xlu1 %v1930_v9, %s2419_s23  ;;  %v827_v8 = vld [vmem:[%s2407_s10 + $0x78] sm:$0xff]  ;;  %s1267_s26 = sshll.u32 %s392_s19, 4  ;;  %s1268_s26 = int_to_ptr.vmem [resolvable:$true] %s1267_s26 }
  0x22   : > { %1480 = vmatprep.subr.mxu1 %v1771_v1  ;;  %1534 = vmatpush3.msra.mxu0 %v827_v8  ;;  %s1709_s24 = scalar_lea.vmem %s1268_s26, 128  ;;  %p1716_p0 = scmp.lt.s32.totalorder %s1268_s26, %s1714_s25 }
  0x23   : > { %1481 = vmatpush3.msra.mxu1 %v406_v10  ;;  %1535 = vmatprep.subr.mxu0 %v1771_v1  ;;  %v825_v10 = vld [vmem:[%s2407_s10 + $0x68] sm:$0xff]  ;;  %p1710_p11 = scmp.ne.s32.totalorder %s1268_s26, %s1709_s24  ;;  %p1717_p1 = scmp.lt.s32.totalorder %s1715_s21, %s1709_s24 }
  0x24   : > { %1482 = vmatprep.subr.mxu1 %v1771_v1 }
  0x25   : > { %1483 = vmatpush3.msra.mxu1 %v405_v11  ;;  %643 = vrot.lane.b32.xlu1 %v1960_v16, %s2419_s23  ;;  %v824_v11 = vld [vmem:[%s2407_s10 + $0x60] sm:$0xff]  ;;  %p1711_p12 = pnand %p1710_p11, %p1873_p5  ;;  %p1718_p2 = por %p1717_p1, %p1716_p0 }
  0x26   : > { %1485 = vmatmul.mubr.msk.f32.vlgmr.msra.gmra.mxu1 %vm413_vm1, %v1948_v12  ;;  %1487 = vmatprep.subr.mxu1 %v490_v13 }
  0x27   : > { %1488 = vmatpush3.msra.mxu1 %v490_v13  ;;  %1495 = vmatprep.mubr.msk.f32.mxu1 %vm491_vm2, %v403_v14  ;;  %v823_v13 = vld [vmem:[%s2407_s10 + $0x58] sm:$0xff]  ;;  %v822_v14 = vld [vmem:[%s2407_s10 + $0x50] sm:$0xff]  ;;  %p1712_p13 = pneg %p1711_p12 }
  0x28   : > { %1489 = vmatprep.subr.mxu1 %v489_v15 }
  0x29   : > { %1490 = vmatpush3.msra.mxu1 %v489_v15  ;;  %641 = vrot.lane.b32.xlu1 %v583_v19, %s2419_s23  ;;  %v821_v15 = vld [vmem:[%s2407_s10 + $0x48] sm:$0xff]  ;;  %p1719_p3 = pnand %p1718_p2, %p1712_p13 }
  0x2a   : > { %1491 = vmatprep.subr.mxu1 %v488_v17 }
  0x2b   : > { %1492 = vmatpush3.msra.mxu1 %v488_v17 }
  0x2c   : > { %1493 = vmatprep.subr.mxu1 %v487_v18 }
  0x2d   : > { %1494 = vmatpush3.msra.mxu1 %v487_v18  ;;  %639 = vrot.lane.b32.xlu1 %v582_v21, %s2419_s23 }
  0x2e   : > { %1496 = vmatmul.mubr.msk.f32.vlgmr.msra.gmra.mxu1 %vm491_vm2, %v404_v20  ;;  %1498 = vmatprep.subr.mxu1 %v1771_v1  ;;  %v819_v20 = vld [vmem:[%s2407_s10 + $0x38] sm:$0xff] }
  0x2f   : > { %1530 = vmatprep.mubr.msk.f32.mxu1 %vm1772_vm0, %v1771_v1 }
  0x31   : > { %637 = vrot.lane.b32.xlu1 %v581_v22, %s2419_s23 }
  0x35   : > { %633 = vrot.lane.b32.xlu1 %v1992_v23, %s2419_s23 }
  0x39   : > { %629 = vrot.lane.b32.xlu1 %v1999_v24, %s2419_s23 }
  0x3d   : > { %625 = vrot.lane.b32.xlu1 %v2006_v25, %s2419_s23 }
  0x41   : > { %621 = vrot.lane.b32.xlu1 %v2013_v26, %s2419_s23 }
  0x8b   : > { %v650_v27 = vpop.permute.xlu1 %649 }
  0x8f   : > { %v2017_v28 = vpop.permute.xlu1 %647 }
  0x93   : > { %v646_v29 = vpop.permute.xlu1 %645 }
  0x97   : > { %v2019_v30 = vpop.permute.xlu1 %643 }
  0x9b   : > { %v642_v31 = vpop.permute.xlu1 %641 }
  0x9f   : > { %v2023_v34 = vpop.permute.xlu1 %639 }
  0xa3   : > { %v638_v40 = vpop.permute.xlu1 %637 }
  0xa7   : > { %v634_v44 = vpop.permute.xlu1 %633 }
  0xab   : > { %v630_v48 = vpop.permute.xlu1 %629 }
  0xaf   : > { %v626_v52 = vpop.permute.xlu1 %625 }
  0xb3   : > { %v622_v56 = vpop.permute.xlu1 %621 }
  0xe6   : > { %v2021_v32 = vpop.f32.mrf.mxu1 }
  0xe8   : > { %v1486_v33 = vpop.f32.mrf.mxu1 }
  0xee   : > { %v2030_v36 = vpop.f32.mrf.mxu1 }
  0xef   : > { %v604_v37 = vmul.f32 %v2030_v36, %v2028_v35  ;;  %v602_v43 = vmul.f32 %v2030_v36, %v1915_v6  ;;  %v600_v49 = vmul.f32 %v2030_v36, %v1960_v16  ;;  %v598_v54 = vmul.f32 %v2030_v36, %v582_v21  ;;  %v818_v21 = vld [vmem:[%s2407_s10 + $0x30] sm:$0xff] }
  0xf0   : > { %v2034_v38 = vpop.f32.mrf.mxu1  ;;  %v596_v60 = vmul.f32 %v2030_v36, %v2078_v58  ;;  %v594_v63 = vmul.f32 %v2030_v36, %v2093_v62  ;;  %v592_v3 = vmul.f32 %v2030_v36, %v2106_v2  ;;  %v590_v6 = vmul.f32 %v2030_v36, %v2119_v5 }
  0xf1   : > { %1499 = vmatpush3.xpose.msk.msra.mxu1 %vm413_vm1, %v604_v37  ;;  %v683_v39 = vmul.f32 %v650_v27, %v2034_v38  ;;  %v603_v41 = vmul.f32 %v1904_v4, %v2034_v38  ;;  %v681_v42 = vmul.f32 %v646_v29, %v2034_v38  ;;  %v679_v45 = vmul.f32 %v642_v31, %v2034_v38  ;;  %v812_v27 = vld [vmem:[%s2407_s10] sm:$0xff] }
  0xf2   : > { %1500 = vmatprep.subr.mxu1 %v1771_v1  ;;  %v601_v46 = vmul.f32 %v1930_v9, %v2034_v38  ;;  %v677_v47 = vmul.f32 %v638_v40, %v2034_v38  ;;  %v675_v50 = vmul.f32 %v634_v44, %v2034_v38  ;;  %v599_v51 = vmul.f32 %v583_v19, %v2034_v38  ;;  %v826_v9 = vld [vmem:[%s2407_s10 + $0x70] sm:$0xff]  ;;  %v820_v19 = vld [vmem:[%s2407_s10 + $0x40] sm:$0xff] }
  0xf3   : > { %944 = vrot.lane.b32.xlu1 %v683_v39, %s2419_s23  ;;  %v673_v53 = vmul.f32 %v630_v48, %v2034_v38  ;;  %v671_v55 = vmul.f32 %v626_v52, %v2034_v38  ;;  %v597_v57 = vmul.f32 %v581_v22, %v2034_v38  ;;  %v669_v59 = vmul.f32 %v622_v56, %v2034_v38  ;;  %v817_v22 = vld [vmem:[%s2407_s10 + $0x28] sm:$0xff]  ;;  %v1038_v48 = vld [vmem:[%s2401_s4 + $0x20] sm:$0xff] }
  0xf4   : > { %v595_v61 = vmul.f32 %v1992_v23, %v2034_v38  ;;  %v593_v0 = vmul.f32 %v1999_v24, %v2034_v38  ;;  %v591_v4 = vmul.f32 %v2006_v25, %v2034_v38  ;;  %v589_v7 = vmul.f32 %v2013_v26, %v2034_v38  ;;  %1536 = vmatpush3.msra.mxu0 %v826_v9  ;;  %v816_v23 = vld [vmem:[%s2407_s10 + $0x20] sm:$0xff]  ;;  %v815_v24 = vld [vmem:[%s2407_s10 + $0x18] sm:$0xff]  ;;  %v814_v25 = vld [vmem:[%s2407_s10 + $0x10] sm:$0xff] }
  0xf5   : > { %1501 = vmatpush3.xpose.msk.msra.mxu1 %vm413_vm1, %v603_v41  ;;  %1537 = vmatprep.subr.mxu0 %v1771_v1  ;;  %v813_v26 = vld [vmem:[%s2407_s10 + $0x8] sm:$0xff]  ;;  %v682_v37 = vmul.f32 %v2030_v36, %v2017_v28  ;;  %v680_v39 = vmul.f32 %v2030_v36, %v2019_v30  ;;  %v678_v40 = vmul.f32 %v2030_v36, %v2023_v34  ;;  %v1034_v9 = vld [vmem:[%s2401_s4] sm:$0xff] }
  0xf6   : > { %1502 = vmatprep.subr.mxu1 %v1771_v1  ;;  %1538 = vmatpush3.msra.mxu0 %v825_v10  ;;  %v1035_v52 = vld [vmem:[%s2401_s4 + $0x8] sm:$0xff]  ;;  %v1134_v10 = vld [vmem:[%s2402_s5 + $0x78] sm:$0xff] }
  0xf7   : > { %940 = vrot.lane.b32.xlu1 %v681_v42, %s2419_s23  ;;  %1539 = vmatprep.subr.mxu0 %v1771_v1 }
  0xf8   : > { %1540 = vmatpush3.msra.mxu0 %v824_v11  ;;  %v1133_v11 = vld [vmem:[%s2402_s5 + $0x70] sm:$0xff] }
  0xf9   : > { %1503 = vmatpush3.xpose.msk.msra.mxu1 %vm413_vm1, %v602_v43  ;;  %1541 = vmatprep.subr.mxu0 %v1771_v1 }
  0xfa   : > { %1504 = vmatprep.subr.mxu1 %v1771_v1  ;;  %1542 = vmatpush3.msra.mxu0 %v823_v13  ;;  %v1132_v13 = vld [vmem:[%s2402_s5 + $0x68] sm:$0xff] }
  0xfb   : > { %936 = vrot.lane.b32.xlu1 %v679_v45, %s2419_s23  ;;  %1543 = vmatprep.subr.mxu0 %v1771_v1 }
  0xfc   : > { %1544 = vmatpush3.msra.mxu0 %v822_v14  ;;  %v1131_v14 = vld [vmem:[%s2402_s5 + $0x60] sm:$0xff] }
  0xfd   : > { %1505 = vmatpush3.xpose.msk.msra.mxu1 %vm413_vm1, %v601_v46  ;;  %1545 = vmatprep.subr.mxu0 %v1771_v1  ;;  %v1041_v46 = vld [vmem:[%s2401_s4 + $0x38] sm:$0xff] }
  0xfe   : > { %1506 = vmatprep.subr.mxu1 %v1771_v1  ;;  %1546 = vmatpush3.msra.mxu0 %v821_v15  ;;  %v1130_v15 = vld [vmem:[%s2402_s5 + $0x58] sm:$0xff] }
  0xff   : > { %932 = vrot.lane.b32.xlu1 %v677_v47, %s2419_s23  ;;  %1547 = vmatprep.subr.mxu0 %v1771_v1  ;;  %v1040_v47 = vld [vmem:[%s2401_s4 + $0x30] sm:$0xff] }
 0x100   : > { %1548 = vmatpush3.msra.mxu0 %v820_v19  ;;  %v1126_v19 = vld [vmem:[%s2402_s5 + $0x38] sm:$0xff] }
 0x101   : > { %1507 = vmatpush3.xpose.msk.msra.mxu1 %vm413_vm1, %v600_v49  ;;  %1549 = vmatprep.subr.mxu0 %v1771_v1  ;;  %v1037_v49 = vld [vmem:[%s2401_s4 + $0x18] sm:$0xff] }
 0x102   : > { %1508 = vmatprep.subr.mxu1 %v1771_v1  ;;  %1550 = vmatpush3.msra.mxu0 %v819_v20  ;;  %v1125_v20 = vld [vmem:[%s2402_s5 + $0x30] sm:$0xff] }
 0x103   : > { %928 = vrot.lane.b32.xlu1 %v675_v50, %s2419_s23  ;;  %1551 = vmatprep.subr.mxu0 %v1771_v1  ;;  %v1036_v50 = vld [vmem:[%s2401_s4 + $0x10] sm:$0xff] }
 0x104   : > { %1552 = vmatpush3.msra.mxu0 %v818_v21  ;;  %v1124_v21 = vld [vmem:[%s2402_s5 + $0x28] sm:$0xff] }
 0x105   : > { %1509 = vmatpush3.xpose.msk.msra.mxu1 %vm413_vm1, %v599_v51  ;;  %1553 = vmatprep.subr.mxu0 %v1771_v1 }
 0x106   : > { %1510 = vmatprep.subr.mxu1 %v1771_v1  ;;  %1554 = vmatpush3.msra.mxu0 %v817_v22  ;;  %v1123_v22 = vld [vmem:[%s2402_s5 + $0x20] sm:$0xff] }
 0x107   : > { %924 = vrot.lane.b32.xlu1 %v673_v53, %s2419_s23  ;;  %1555 = vmatprep.subr.mxu0 %v1771_v1 }
 0x108   : > { %1556 = vmatpush3.msra.mxu0 %v816_v23  ;;  %v1122_v23 = vld [vmem:[%s2402_s5 + $0x18] sm:$0xff] }
 0x109   : > { %1511 = vmatpush3.xpose.msk.msra.mxu1 %vm413_vm1, %v598_v54  ;;  %1557 = vmatprep.subr.mxu0 %v1771_v1 }
 0x10a   : > { %1512 = vmatprep.subr.mxu1 %v1771_v1  ;;  %1558 = vmatpush3.msra.mxu0 %v815_v24  ;;  %v1121_v24 = vld [vmem:[%s2402_s5 + $0x10] sm:$0xff] }
 0x10b   : > { %920 = vrot.lane.b32.xlu1 %v671_v55, %s2419_s23  ;;  %1559 = vmatprep.subr.mxu0 %v1771_v1 }
 0x10c   : > { %1560 = vmatpush3.msra.mxu0 %v814_v25  ;;  %v1120_v25 = vld [vmem:[%s2402_s5 + $0x8] sm:$0xff] }
 0x10d   : > { %1513 = vmatpush3.xpose.msk.msra.mxu1 %vm413_vm1, %v597_v57  ;;  %1561 = vmatprep.subr.mxu0 %v1771_v1 }
 0x10e   : > { %1514 = vmatprep.subr.mxu1 %v1771_v1  ;;  %1562 = vmatpush3.msra.mxu0 %v813_v26 }
 0x10f   : > { %916 = vrot.lane.b32.xlu1 %v669_v59, %s2419_s23  ;;  %1563 = vmatprep.subr.mxu0 %v1771_v1 }
 0x110   : > { %1564 = vmatpush3.msra.mxu0 %v812_v27 }
 0x111   : > { %1515 = vmatpush3.xpose.msk.msra.mxu1 %vm413_vm1, %v596_v60  ;;  %1568 = vmatprep.subr.mxu0 %v1771_v1 }
 0x112   : > { %1516 = vmatprep.subr.mxu1 %v1771_v1 }
 0x115   : > { %1517 = vmatpush3.xpose.msk.msra.mxu1 %vm413_vm1, %v595_v61 }
 0x116   : > { %1518 = vmatprep.subr.mxu1 %v1771_v1 }
 0x119   : > { %1519 = vmatpush3.xpose.msk.msra.mxu1 %vm413_vm1, %v594_v63 }
 0x11a   : > { %1520 = vmatprep.subr.mxu1 %v1771_v1 }
 0x11d   : > { %1521 = vmatpush3.xpose.msk.msra.mxu1 %vm413_vm1, %v593_v0 }
 0x11e   : > { %1522 = vmatprep.subr.mxu1 %v1771_v1 }
 0x121   : > { %1523 = vmatpush3.xpose.msk.msra.mxu1 %vm413_vm1, %v592_v3 }
 0x122   : > { %1524 = vmatprep.subr.mxu1 %v1771_v1 }
 0x125   : > { %1525 = vmatpush3.xpose.msk.msra.mxu1 %vm413_vm1, %v591_v4 }
 0x126   : > { %1526 = vmatprep.subr.mxu1 %v1771_v1 }
 0x129   : > { %1527 = vmatpush3.xpose.msk.msra.mxu1 %vm413_vm1, %v590_v6 }
 0x12a   : > { %1528 = vmatprep.subr.mxu1 %v1771_v1 }
 0x12d   : > { %1529 = vmatpush3.xpose.msk.msra.mxu1 %vm413_vm1, %v589_v7 }
 0x12e   : > { %1603 = vmatprep.subr.mxu1 %v1771_v1 }
 0x130   : > { %1531 = vmatmul.mubr.msk.f32.vlgmr.msra.gmra.mxu1 %vm413_vm1, %v2021_v32 }
 0x131   : > { %1619 = vmatprep.mubr.msk.f32.mxu1 %vm1772_vm0, %v1771_v1  ;;  %1604 = vmatpush3.msra.mxu1 %v1041_v46 }
 0x132   : > { %1605 = vmatprep.subr.mxu1 %v1771_v1 }
 0x133   : > { %1606 = vmatpush3.msra.mxu1 %v1040_v47 }
 0x134   : > { %1607 = vmatprep.subr.mxu1 %v1771_v1 }
 0x165   : > { %v945_v51 = vpop.permute.xlu1 %944 }
 0x169   : > { %v941_v53 = vpop.permute.xlu1 %940 }
 0x16d   : > { %v937_v54 = vpop.permute.xlu1 %936 }
 0x171   : > { %v933_v57 = vpop.permute.xlu1 %932 }
 0x175   : > { %v929_v59 = vpop.permute.xlu1 %928 }
 0x1f0   : > { %v802_v16 = vpop.f32.mrf.mxu1 }
 0x1f1   : > { %v806_v17 = vmul.f32 0.35355338, %v802_v16  ;;  %v1129_v16 = vld [vmem:[%s2402_s5 + $0x50] sm:$0xff] }
 0x1f2   : > { %v1532_v18 = vpop.f32.mrf.mxu1 }
 0x1f3   : > { %807 = vmax.xlane.f32.xlu0 %v806_v17  ;;  %v1127_v18 = vld [vmem:[%s2402_s5 + $0x40] sm:$0xff] }
 0x209   : > { %651 = vrot.lane.b32.xlu0 %v2028_v35, %s2419_s23 }
 0x20d   : > { %635 = vrot.lane.b32.xlu0 %v2078_v58, %s2419_s23 }
 0x211   : > { %631 = vrot.lane.b32.xlu0 %v2093_v62, %s2419_s23  ;;  %v925_v62 = vpop.permute.xlu1 %924 }
 0x215   : > { %627 = vrot.lane.b32.xlu0 %v2106_v2, %s2419_s23  ;;  %v921_v0 = vpop.permute.xlu1 %920 }
 0x219   : > { %623 = vrot.lane.b32.xlu0 %v2119_v5, %s2419_s23  ;;  %v917_v4 = vpop.permute.xlu1 %916 }
 0x27c   : > { %v808_v29 = vpop.xlane.xlu0 %807 }
 0x27d   : > { %v809_v31 = vsub.f32 %v806_v17, %v808_v29  ;;  %v1128_v17 = vld [vmem:[%s2402_s5 + $0x48] sm:$0xff]  ;;  %v1119_v29 = vld [vmem:[%s2402_s5] sm:$0xff] }
 0x27f   : > { %v810_v32 = vmul.f32 1.442695, %v809_v31 }
 0x280   : > { %v652_v33 = vpop.permute.xlu0 %651 }
 0x281   : > { %1699 = vpow2.f32 %v810_v32  ;;  %v684_v35 = vmul.f32 %v2030_v36, %v652_v33 }
 0x283   : > { %946 = vrot.lane.b32.xlu0 %v684_v35, %s2419_s23 }
 0x284   : > { %v636_v38 = vpop.permute.xlu0 %635 }
 0x285   : > { %v676_v28 = vmul.f32 %v2030_v36, %v636_v38 }
 0x287   : > { %942 = vrot.lane.b32.xlu0 %v682_v37, %s2419_s23  ;;  %v1367_v37 = vld [vmem:[%s2403_s6] ss:$0 sm:$0xff] }
 0x288   : > { %v632_v42 = vpop.permute.xlu0 %631 }
 0x289   : > { %v674_v43 = vmul.f32 %v2030_v36, %v632_v42 }
 0x28b   : > { %938 = vrot.lane.b32.xlu0 %v680_v39, %s2419_s23 }
 0x28c   : > { %v628_v30 = vpop.permute.xlu0 %627 }
 0x28d   : > { %v672_v34 = vmul.f32 %v2030_v36, %v628_v30 }
 0x28e   : > { %v2219_v41 = vpop.eup %1699 }
 0x28f   : > { %1566 = vmatmul.mubr.f32.vlgmr.msra.gmra.mxu0 %v2219_v41  ;;  %934 = vrot.lane.b32.xlu0 %v678_v40, %s2419_s23 }
 0x290   : > { %1600 = vmatprep.mubr.msk.f32.mxu0 %vm1772_vm0, %v1771_v1  ;;  %v624_v44 = vpop.permute.xlu0 %623 }
 0x291   : > { %v670_v45 = vmul.f32 %v2030_v36, %v624_v44  ;;  %v1039_v36 = vld [vmem:[%s2401_s4 + $0x28] sm:$0xff] }
 0x292   : > { %1608 = vmatpush3.msra.mxu1 %v1039_v36 }
 0x293   : > { %930 = vrot.lane.b32.xlu0 %v676_v28, %s2419_s23  ;;  %1609 = vmatprep.subr.mxu1 %v1771_v1 }
 0x294   : > { %1610 = vmatpush3.msra.mxu1 %v1038_v48 }
 0x295   : > { %1611 = vmatprep.subr.mxu1 %v1771_v1 }
 0x296   : > { %1612 = vmatpush3.msra.mxu1 %v1037_v49 }
 0x297   : > { %926 = vrot.lane.b32.xlu0 %v674_v43, %s2419_s23  ;;  %1613 = vmatprep.subr.mxu1 %v1771_v1 }
 0x298   : > { %1614 = vmatpush3.msra.mxu1 %v1036_v50 }
 0x299   : > { %1615 = vmatprep.subr.mxu1 %v1771_v1 }
 0x29a   : > { %1616 = vmatpush3.msra.mxu1 %v1035_v52 }
 0x29b   : > { %922 = vrot.lane.b32.xlu0 %v672_v34, %s2419_s23  ;;  %1617 = vmatprep.subr.mxu1 %v1771_v1 }
 0x29c   : > { %1618 = vmatpush3.msra.mxu1 %v1034_v9 }
 0x29f   : > { %918 = vrot.lane.b32.xlu0 %v670_v45, %s2419_s23 }
 0x2a3   : > { %1115 = vrot.lane.b32.xlu0 %v1948_v12, %s2419_s23 }
 0x2f5   : > { %v947_v55 = vpop.permute.xlu0 %946 }
 0x2f6   : > { %1569 = vmatpush3.msra.mxu0 %v947_v55  ;;  %v1370_v55 = vld [vmem:[%s2405_s8] ss:$0 sm:$0xff] }
 0x2f7   : > { %1570 = vmatprep.subr.mxu0 %v1771_v1 }
 0x2f8   : > { %1571 = vmatpush3.msra.mxu0 %v945_v51 }
 0x2f9   : > { %1572 = vmatprep.subr.mxu0 %v1771_v1  ;;  %v943_v56 = vpop.permute.xlu0 %942 }
 0x2fa   : > { %1573 = vmatpush3.msra.mxu0 %v943_v56 }
 0x2fb   : > { %1574 = vmatprep.subr.mxu0 %v1771_v1 }
 0x2fc   : > { %1575 = vmatpush3.msra.mxu0 %v941_v53  ;;  %v1369_v53 = vld [vmem:[%s2404_s7] ss:$0 sm:$0xff] }
 0x2fd   : > { %1576 = vmatprep.subr.mxu0 %v1771_v1  ;;  %v939_v58 = vpop.permute.xlu0 %938 }
 0x2fe   : > { %1577 = vmatpush3.msra.mxu0 %v939_v58 }
 0x2ff   : > { %1578 = vmatprep.subr.mxu0 %v1771_v1 }
 0x300   : > { %1579 = vmatpush3.msra.mxu0 %v937_v54 }
 0x301   : > { %1580 = vmatprep.subr.mxu0 %v1771_v1  ;;  %v935_v60 = vpop.permute.xlu0 %934 }
 0x302   : > { %1581 = vmatpush3.msra.mxu0 %v935_v60 }
 0x303   : > { %1582 = vmatprep.subr.mxu0 %v1771_v1 }
 0x304   : > { %1583 = vmatpush3.msra.mxu0 %v933_v57 }
 0x305   : > { %1584 = vmatprep.subr.mxu0 %v1771_v1  ;;  %v931_v61 = vpop.permute.xlu0 %930 }
 0x306   : > { %1585 = vmatpush3.msra.mxu0 %v931_v61 }
 0x307   : > { %1586 = vmatprep.subr.mxu0 %v1771_v1 }
 0x308   : > { %1587 = vmatpush3.msra.mxu0 %v929_v59 }
 0x309   : > { %1588 = vmatprep.subr.mxu0 %v1771_v1  ;;  %v927_v63 = vpop.permute.xlu0 %926 }
 0x30a   : > { %1589 = vmatpush3.msra.mxu0 %v927_v63 }
 0x30b   : > { %1590 = vmatprep.subr.mxu0 %v1771_v1 }
 0x30c   : > { %1591 = vmatpush3.msra.mxu0 %v925_v62 }
 0x30d   : > { %1592 = vmatprep.subr.mxu0 %v1771_v1  ;;  %v923_v2 = vpop.permute.xlu0 %922 }
 0x30e   : > { %1593 = vmatpush3.msra.mxu0 %v923_v2 }
 0x30f   : > { %1594 = vmatprep.subr.mxu0 %v1771_v1 }
 0x310   : > { %1595 = vmatpush3.msra.mxu0 %v921_v0 }
 0x311   : > { %1596 = vmatprep.subr.mxu0 %v1771_v1  ;;  %v919_v3 = vpop.permute.xlu0 %918 }
 0x312   : > { %1597 = vmatpush3.msra.mxu0 %v919_v3 }
 0x313   : > { %1598 = vmatprep.subr.mxu0 %v1771_v1 }
 0x314   : > { %1599 = vmatpush3.msra.mxu0 %v917_v4 }
 0x315   : > { %1622 = vmatprep.subr.mxu0 %v1771_v1  ;;  %v1116_v31 = vpop.permute.xlu0 %1115 }
 0x34f   : > { %v894_v5 = vpop.f32.mrf.mxu0 }
 0x350   : > { %1701 = vrcp.f32 %v894_v5 }
 0x351   : > { %v1567_v6 = vpop.f32.mrf.mxu0 }
 0x35d   : > { %v1702_v7 = vpop.eup %1701 }
 0x35e   : > { %v899_v8 = vmul.f32 %v1702_v7, %v2219_v41 }
 0x360   : > { %1601 = vmatmul.mubr.f32.vlgmr.msra.gmra.mxu0 %v899_v8 }
 0x361   : > { %1654 = vmatprep.mubr.msk.f32.mxu0 %vm1772_vm0, %v1771_v1  ;;  %1623 = vmatpush3.msra.mxu0 %v1134_v10 }
 0x362   : > { %1624 = vmatprep.subr.mxu0 %v1771_v1 }
 0x363   : > { %1625 = vmatpush3.msra.mxu0 %v1133_v11 }
 0x364   : > { %1626 = vmatprep.subr.mxu0 %v1771_v1 }
 0x365   : > { %1627 = vmatpush3.msra.mxu0 %v1132_v13 }
 0x366   : > { %1628 = vmatprep.subr.mxu0 %v1771_v1 }
 0x367   : > { %1629 = vmatpush3.msra.mxu0 %v1131_v14 }
 0x368   : > { %1630 = vmatprep.subr.mxu0 %v1771_v1 }
 0x369   : > { %1631 = vmatpush3.msra.mxu0 %v1130_v15 }
 0x36a   : > { %1632 = vmatprep.subr.mxu0 %v1771_v1 }
 0x36b   : > { %1633 = vmatpush3.msra.mxu0 %v1129_v16 }
 0x36c   : > { %1634 = vmatprep.subr.mxu0 %v1771_v1 }
 0x36d   : > { %1635 = vmatpush3.msra.mxu0 %v1128_v17 }
 0x36e   : > { %1636 = vmatprep.subr.mxu0 %v1771_v1 }
 0x36f   : > { %1637 = vmatpush3.msra.mxu0 %v1127_v18 }
 0x370   : > { %1638 = vmatprep.subr.mxu0 %v1771_v1 }
 0x371   : > { %1639 = vmatpush3.msra.mxu0 %v1126_v19 }
 0x372   : > { %1640 = vmatprep.subr.mxu0 %v1771_v1 }
 0x373   : > { %1641 = vmatpush3.msra.mxu0 %v1125_v20 }
 0x374   : > { %1642 = vmatprep.subr.mxu0 %v1771_v1 }
 0x375   : > { %1643 = vmatpush3.msra.mxu0 %v1124_v21 }
 0x376   : > { %1644 = vmatprep.subr.mxu0 %v1771_v1 }
 0x377   : > { %1645 = vmatpush3.msra.mxu0 %v1123_v22 }
 0x378   : > { %1646 = vmatprep.subr.mxu0 %v1771_v1 }
 0x379   : > { %1647 = vmatpush3.msra.mxu0 %v1122_v23 }
 0x37a   : > { %1648 = vmatprep.subr.mxu0 %v1771_v1 }
 0x37b   : > { %1649 = vmatpush3.msra.mxu0 %v1121_v24 }
 0x37c   : > { %1650 = vmatprep.subr.mxu0 %v1771_v1 }
 0x37d   : > { %1651 = vmatpush3.msra.mxu0 %v1120_v25 }
 0x37e   : > { %1652 = vmatprep.subr.mxu0 %v1771_v1 }
 0x37f   : > { %1653 = vmatpush3.msra.mxu0 %v1119_v29 }
 0x420   : > { %v1030_v26 = vpop.f32.mrf.mxu0 }
 0x421   : > { %1620 = vmatmul.mubr.msk.f32.vlgmr.msra.gmra.mxu1 %vm413_vm1, %v1030_v26 }
 0x422   : > { %v1602_v27 = vpop.f32.mrf.mxu0 }
 0x4e1   : > { %v1111_v32 = vpop.f32.mrf.mxu1 }
 0x4e2   : > { %v1118_v33 = vsel %vm413_vm1, %v1111_v32, %v1116_v31 }
 0x4e3   : > { %v1621_v35 = vpop.f32.mrf.mxu1  ;;  %1655 = vmatmul.mubr.f32.vlgmr.msra.gmra.mxu0 %v1118_v33 }
 0x5a3   : > { %v1208_v1 = vpop.f32.mrf.mxu0 }
 0x5a4   : > { %v1209_v38 = vadd.f32 %v1367_v37, %v1208_v1 }
 0x5a5   : > { %v1656_v39 = vpop.f32.mrf.mxu0 }
 0x5a6   : > { %v1368_v40 = vmul.f32 -1.442695, %v1209_v38 }
 0x5a8   : > { %1703 = vpow2.f32 %v1368_v40 }
 0x5b5   : > { %v1704_v41 = vpop.eup %1703 }
 0x5b6   : > { %v1215_v42 = vadd.f32 1.0, %v1704_v41 }
 0x5b8   : > { %1705 = vrcp.f32 %v1215_v42 }
 0x5c5   : > { %v1706_v28 = vpop.eup %1705 }
 0x5c6   : > { %v1219_v30 = vsub.f32 1.0, %v1706_v28  ;;  %v1218_v43 = vmul.f32 %v1706_v28, %v1111_v32 }
 0x5c8   : > { %v1220_v34 = vmul.f32 %v1219_v30, %v1948_v12 }
 0x5ca   : > { %v1221_v44 = vadd.f32 %v1220_v34, %v1218_v43 }
 0x5cc   : > { %v1222_v45 = vsel %vm413_vm1, %v1221_v44, 0.0 }
 0x5cd   : > { %1223 = vadd.xlane.f32.xlu1 %v1222_v45 }
 0x656   : > { %v1224_v46 = vpop.xlane.xlu1 %1223 }
 0x657   : > { %v1226_v47 = vmul.f32 0.015625, %v1224_v46 }
 0x659   : > { %v1227_v36 = vsub.f32 %v1221_v44, %v1226_v47 }
 0x65b   : > { %v1228_v48 = vmul.f32 %v1227_v36, %v1227_v36 }
 0x65d   : > { %v1229_v49 = vsel %vm413_vm1, %v1228_v48, 0.0 }
 0x65e   : > { %1230 = vadd.xlane.f32.xlu0 %v1229_v49 }
 0x6e7   : > { %v1231_v50 = vpop.xlane.xlu0 %1230 }
 0x6e8   : > { %v1232_v51 = vmul.f32 0.015625, %v1231_v50 }
 0x6ea   : > { %v1233_v52 = vadd.f32 1e-05, %v1232_v51 }
 0x6ec   : > { %1707 = vrsqrt.f32 %v1233_v52 }
 0x6f9   : > { %v1708_v12 = vpop.eup %1707 }
 0x6fa   : > { %v1235_v54 = vmul.f32 %v1708_v12, %v1227_v36 }
 0x6fc   : > { %v1243_v56 = vmul.f32 %v1369_v53, %v1235_v54 }
 0x6fe   : > { %v1251_v57 = vadd.f32 %v1370_v55, %v1243_v56 }
 0x700   : > { %1252 = vst.msk [vmem:[%s392_s19] sm:$0xff] %vm413_vm1, %v1251_v57 }
 0x701   : > { %1722 = shalt.err (!%p1719_p3)
}
 0x702   : > { %s1723_s15 = scalar_lea.hbm %s1265_s29, 128  ;;  %s1727_s13 = scalar_lea.hbm %s2408_s11, 256 }
 0x703   : > { %p1724_p4 = scmp.ne.s32.totalorder %s1265_s29, %s1723_s15  ;;  %p1728_p9 = scmp.lt.s32.totalorder %s1265_s29, %s2408_s11 }
 0x704   : > { %p1729_p10 = scmp.lt.s32.totalorder %s1727_s13, %s1723_s15 }
 0x705   : > { %p1725_p7 = pnand %p1724_p4, %p1873_p5 }
 0x706   : > { %p1730_p11 = por %p1729_p10, %p1728_p9 }
 0x707   : > { %p1726_p8 = pneg %p1725_p7 }
 0x709   : > { %p1731_p12 = pnand %p1730_p11, %p1726_p8 }
 0x70b   : > { %1734 = shalt.err (!%p1731_p12)
}
 0x70c   : > { %1657 = dma.vmem_to_hbm [thread:$0]  (%p1873_p5), %s1268_s26, 128, %s1265_s29, %s1254_s14  }
 0x70d PF: > { %p1663_p13 = scmp.ge.s32.totalorder %s1769_s20, 2  ;;  %s1279_s22 = sand.u32 1, %s1757_s17  }
 0x70e   : > { %s1280_s24 = scalar_lea.sflag [#allocation3], %s1279_s22 }
 0x70f   : > { %p1660_p0 = pnand %p1663_p13, %p1877_p6 }
 0x711   : > { %p1661_p1 = pneg %p1660_p0 }
 0x713   : > { %1752 = dma.done.wait (%p1661_p1), %s1280_s24, 128  }
 0x714   : > { %1754 = vsyncadd (%p1661_p1), %s1280_s24, 4294967168  ;;  %s2420_s20 = sld [smem:[#allocation6_spill]]  ;;  %s2423_s17 = smov %s1761_s18 }
 0x715   : > { %s2421_s16 = sld [smem:[#allocation5_spill]] }
 0x716   : > { %s2422_s19 = sld [smem:[#allocation7_spill]] }
 0x71a   : > { %p21_p2 = scmp.ge.s32.totalorder %s2420_s20, 4  }
 0x71b   : > { %s2424_s18 = smov %s2421_s16 }
 0x71c   :  { %23 = sbr.rel (!%p21_p2) target bundleno = 3 (0x3), region = 102 }
 0x721   :  { %1285 = vsyncpa [#allocation3], 1 }
 0x722   :  { %1287 = vsyncpa [#allocation3 + $0x1], 1 }

</bundles_post_ra>
